<compile_context>
chip_gen: v7x
topology: tpu7x:2x2x1
jax: 0.10.0
libtpu: 0.0.40
codegen_flags: <defaults>
</compile_context>

<pallas_src>
import functools

import jax
import jax.numpy as jnp
import numpy as np
from jax.experimental import pallas as pl
from jax.experimental.pallas import tpu as pltpu


# ----------------------------------------------------------------------------- kernels
def _context_filter_tiled_kernel(ent_i_ref, ent_j_ref, nrm_i_ref, nrm_j_ref,
                                 ctx_i_ref, ctx_j_ref, out_ref,
                                 *, alpha, threshold, matmul_dtype):
    # ent_i/nrm_i : (1, T, 1)   row-block quantities (index i)
    # ent_j/nrm_j : (1, 1, T)   col-block quantities (index j)
    # ctx_i       : (1, T, D)   resident across the innermost j axis
    # ctx_j       : (1, T, D)
    # out         : (1, T, T)
    ctx_i = ctx_i_ref[0]
    ctx_j = ctx_j_ref[0]
    ent_i = ent_i_ref[0]                       # (T, 1)
    ent_j = ent_j_ref[0]                       # (1, T)
    nrm_i = nrm_i_ref[0]                       # (T, 1)
    nrm_j = nrm_j_ref[0]                       # (1, T)

    if matmul_dtype is not None:
        ctx_i = ctx_i.astype(matmul_dtype)
        ctx_j = ctx_j.astype(matmul_dtype)

    # gram[i, j] = <ctx[i], ctx[j]> : contract the last dims (A · Bᵀ) so the MXU is
    # fed directly, no explicit transpose of the (T, D) tile.
    gram = jax.lax.dot_general(ctx_i, ctx_j, (((1,), (1,)), ((), ())),
                               preferred_element_type=jnp.float32)        # (T, T)

    inv_denom = pl.reciprocal(1e-6 + nrm_i * nrm_j, approx=True)          # EUP slot
    # score[i, j] = alpha*ent[j] + 1 - alpha*cos[i, j]
    score = (alpha * ent_j + 1.0) - alpha * (gram * inv_denom)
    # keep the multiply form so threshold < 0 behaves exactly like the torch code
    s2mask = jnp.where(ent_i == 0.0, 0.0, 1.0) * jnp.where(ent_j == 0.0, 0.0, 1.0)
    out_ref[0] = jnp.where(score * s2mask > threshold, 1.0, 0.0).astype(out_ref.dtype)

    # Diagonal zeroing only exists on diagonal tiles (same row/col block index).
    @pl.when(pl.program_id(1) == pl.program_id(2))
    def _():
        ti, tj = out_ref.shape[1], out_ref.shape[2]
        ii = jax.lax.broadcasted_iota(jnp.int32, (ti, tj), 0)
        jj = jax.lax.broadcasted_iota(jnp.int32, (ti, tj), 1)
        out_ref[0] = jnp.where(ii == jj, 0.0, out_ref[0]).astype(out_ref.dtype)


def _context_filter_batched_kernel(ent_row_ref, ent_col_ref, nrm_row_ref, nrm_col_ref,
                                   ctx_ref, out_ref, *, alpha, threshold, matmul_dtype):
    # Small-U path: whole (U, U) plane per batch element, BT batch elements per step.
    ctx = ctx_ref[...]                         # (BT, U, D)
    ent_row = ent_row_ref[...]                 # (BT, 1, U)
    ent_col = ent_col_ref[...]                 # (BT, U, 1)
    nrm_row = nrm_row_ref[...]                 # (BT, 1, U)
    nrm_col = nrm_col_ref[...]                 # (BT, U, 1)

    a = ctx if matmul_dtype is None else ctx.astype(matmul_dtype)
    # Batched gram on the MXU (contract d, batch b) — no transposes.
    gram = jnp.einsum('bid,bjd->bij', a, a,
                      preferred_element_type=jnp.float32)                 # (BT, U, U)

    inv_denom = pl.reciprocal(1e-6 + nrm_col * nrm_row, approx=True)
    score = (alpha * ent_row + 1.0) - alpha * (gram * inv_denom)
    s2mask = jnp.where(ent_col == 0.0, 0.0, 1.0) * jnp.where(ent_row == 0.0, 0.0, 1.0)
    pred = (score * s2mask) > threshold

    bt, u, _ = gram.shape
    ii = jax.lax.broadcasted_iota(jnp.int32, (bt, u, u), 1)
    jj = jax.lax.broadcasted_iota(jnp.int32, (bt, u, u), 2)
    # single fused select: thresholding + diagonal zeroing
    out_ref[...] = jnp.where(pred & (ii != jj), 1.0, 0.0).astype(out_ref.dtype)


# ----------------------------------------------------------------------------- wrapper
def _largest_divisor_at_most(n, cap):
    cap = max(1, min(n, int(cap)))
    for d in range(cap, 0, -1):
        if n % d == 0:
            return d
    return 1


def _pick_tile(U, D):
    # Largest lane-aligned tile whose double-buffered blocks stay well under the
    # smallest scoped-VMEM default (v5e: 16 MiB); all candidates are 128 multiples.
    budget = 12 * 1024 * 1024
    u_cap = ((U + 127) // 128) * 128
    for t in (512, 384, 256, 128):
        if t > u_cap:
            continue
        block_bytes = (2 * t * D + t * t + 4 * t) * 4
        if 2 * block_bytes <= budget:          # x2 for double buffering
            return t
    return 128


def context_filter_forward(context, ent, alpha, threshold, *,
                           out_dtype=jnp.float32, matmul_dtype=None):
    """context: (B, U, D) f32, ent: (B, U) f32 -> mask (B, U, U) out_dtype.

    out_dtype=jnp.bfloat16 halves the dominant HBM writeback (0/1 exactly
    representable); matmul_dtype=jnp.bfloat16 uses the fast MXU path on v6e/v7x
    (may flip knife-edge threshold entries). Defaults keep exact f32 parity.
    """
    context = jnp.asarray(context, jnp.float32)
    ent = jnp.asarray(ent, jnp.float32)
    B, U, D = context.shape
    alpha = float(alpha)
    threshold = float(threshold)

    # Per-utterance L2 norms, computed once (avoids per-tile recompute and
    # in-kernel relayouts); streamed in both row and column orientations.
    norms = jnp.sqrt(jnp.sum(context * context, axis=-1))                 # (B, U)

    if U <= 128:
        # ---------------- small-U path: batch many b per grid step -----------
        per_b_bytes = (U * D + U * U + 4 * U) * 4 * 2      # x2 double buffering
        BT = _largest_divisor_at_most(B, (4 * 1024 * 1024) // max(per_b_bytes, 1))
        ent_row = ent.reshape(B, 1, U)
        ent_col = ent.reshape(B, U, 1)
        nrm_row = norms.reshape(B, 1, U)
        nrm_col = norms.reshape(B, U, 1)
        kernel = functools.partial(_context_filter_batched_kernel, alpha=alpha,
                                   threshold=threshold, matmul_dtype=matmul_dtype)
        # TODO(synk): for tiny U the output last dim (<128) still lowers to masked
        # stores; a lane-dense repack is possible but not worth it at these sizes.
        return pl.pallas_call(
            kernel,
            out_shape=jax.ShapeDtypeStruct((B, U, U), out_dtype),
            grid=(B // BT,),
            in_specs=[
                pl.BlockSpec((BT, 1, U), lambda b: (b, 0, 0)),
                pl.BlockSpec((BT, U, 1), lambda b: (b, 0, 0)),
                pl.BlockSpec((BT, 1, U), lambda b: (b, 0, 0)),
                pl.BlockSpec((BT, U, 1), lambda b: (b, 0, 0)),
                pl.BlockSpec((BT, U, D), lambda b: (b, 0, 0)),
            ],
            out_specs=pl.BlockSpec((BT, U, U), lambda b: (b, 0, 0)),
            compiler_params=pltpu.CompilerParams(dimension_semantics=("parallel",)),
        )(ent_row, ent_col, nrm_row, nrm_col, context)

    # -------------------- large-U path: lane-dense (T, T) tiling -------------
    tile = _pick_tile(U, D)
    U_pad = -(-U // tile) * tile
    pad = U_pad - U
    if pad:
        context_p = jnp.pad(context, ((0, 0), (0, pad), (0, 0)))
        ent_p = jnp.pad(ent, ((0, 0), (0, pad)))
        nrm_p = jnp.pad(norms, ((0, 0), (0, pad)))
    else:
        context_p, ent_p, nrm_p = context, ent, norms

    ent_row = ent_p.reshape(B, 1, U_pad)
    ent_col = ent_p.reshape(B, U_pad, 1)
    nrm_row = nrm_p.reshape(B, 1, U_pad)
    nrm_col = nrm_p.reshape(B, U_pad, 1)
    n_t = U_pad // tile

    kernel = functools.partial(_context_filter_tiled_kernel, alpha=alpha,
                               threshold=threshold, matmul_dtype=matmul_dtype)
    out = pl.pallas_call(
        kernel,
        out_shape=jax.ShapeDtypeStruct((B, U_pad, U_pad), out_dtype),
        grid=(B, n_t, n_t),                    # j innermost: row ctx block stays resident
        in_specs=[
            pl.BlockSpec((1, tile, 1), lambda b, i, j: (b, i, 0)),   # ent[b, i]
            pl.BlockSpec((1, 1, tile), lambda b, i, j: (b, 0, j)),   # ent[b, j]
            pl.BlockSpec((1, tile, 1), lambda b, i, j: (b, i, 0)),   # ||ctx[b, i]||
            pl.BlockSpec((1, 1, tile), lambda b, i, j: (b, 0, j)),   # ||ctx[b, j]||
            pl.BlockSpec((1, tile, D), lambda b, i, j: (b, i, 0)),   # ctx row block
            pl.BlockSpec((1, tile, D), lambda b, i, j: (b, j, 0)),   # ctx col block
        ],
        out_specs=pl.BlockSpec((1, tile, tile), lambda b, i, j: (b, i, j)),
        compiler_params=pltpu.CompilerParams(
            dimension_semantics=("parallel", "parallel", "parallel")),
    )(ent_col, ent_row, nrm_col, nrm_row, context_p, context_p)

    if pad:
        out = out[:, :U, :U]
    return out


# ----------------------------------------------------------------------------- reference / check
def _reference(context, ent, alpha, threshold):
    """Plain-JAX mirror of the PyTorch forward; returns (mask, ret_score)."""
    gram = jnp.einsum('bid,bjd->bij', context, context,
                      precision=jax.lax.Precision.HIGHEST)
    norms = jnp.sqrt(jnp.sum(context * context, axis=-1))
    denom = 1e-6 + norms[:, :, None] * norms[:, None, :]
    cos = gram / denom
    score = alpha * ent[:, None, :] + 1.0 - alpha * cos
    s2 = jnp.where(ent == 0.0, 0.0, 1.0)
    ret = score * (s2[:, :, None] * s2[:, None, :])
    mask = jnp.where(ret > threshold, 1.0, 0.0)
    eye = jnp.eye(context.shape[1], dtype=mask.dtype)
    return mask * (1.0 - eye)[None], ret


def _check(out, context, ent, alpha, threshold, band=5e-3):
    ref_mask, ref_ret = _reference(context, ent, alpha, threshold)
    ref_mask = np.asarray(ref_mask)
    ref_ret = np.asarray(ref_ret)
    out = np.asarray(out, dtype=np.float32)
    assert np.all((out == 0.0) | (out == 1.0)), "mask must be 0/1 valued"
    U = out.shape[1]
    diag = np.broadcast_to(np.eye(U, dtype=bool)[None], out.shape)
    assert np.all(out[diag] == 0.0), "diagonal must be zero"
    # Entries whose score is not within `band` of the threshold must match exactly;
    # the approx-reciprocal (EUP) path may legitimately flip knife-edge entries.
    decided = (np.abs(ref_ret - threshold) > band) & (~diag)
    np.testing.assert_array_equal(out[decided], ref_mask[decided])


if __name__ == "__main__":
    alpha, threshold = 0.5, 0.9
    key = jax.random.PRNGKey(0)
    k1, k2, k3, k4 = jax.random.split(key, 4)

    # Small-U path (typical dialogue shape): batch=2, utts=8, emb_dim=32.
    B, U, D = 2, 8, 32
    ctx_s = jax.random.normal(k1, (B, U, D), dtype=jnp.float32)
    ent_s = jax.random.uniform(k2, (B, U), dtype=jnp.float32)
    ent_s = ent_s.at[:, ::3].set(0.0)          # exercise the exact ent == 0 mask path
    out_s = jax.block_until_ready(context_filter_forward(ctx_s, ent_s, alpha, threshold))
    _check(out_s, ctx_s, ent_s, alpha, threshold)

    # Tiled path (lane-dense 128-multiple tiles): batch=2, utts=256, emb_dim=64.
    B2, U2, D2 = 2, 256, 64
    ctx_l = jax.random.normal(k3, (B2, U2, D2), dtype=jnp.float32)
    ent_l = jax.random.uniform(k4, (B2, U2), dtype=jnp.float32)
    ent_l = ent_l.at[:, ::5].set(0.0)
    out_l = jax.block_until_ready(context_filter_forward(ctx_l, ent_l, alpha, threshold))
    _check(out_l, ctx_l, ent_l, alpha, threshold)

    print("KERNEL_OK")
</pallas_src>

<mosaic_0001>
module attributes {stable_mosaic.version = 11 : i64} {
  func.func @_context_filter_batched_kernel(%arg0: i32, %arg1: memref<2x1x8xf32, #tpu.memory_space<vmem>>, %arg2: memref<2x8x1xf32, #tpu.memory_space<vmem>>, %arg3: memref<2x1x8xf32, #tpu.memory_space<vmem>>, %arg4: memref<2x8x1xf32, #tpu.memory_space<vmem>>, %arg5: memref<2x8x32xf32, #tpu.memory_space<vmem>>, %arg6: memref<2x8x8xf32, #tpu.memory_space<vmem>>) attributes {dimension_semantics = [#tpu.dimension_semantics<parallel>], iteration_bounds = array<i64: 1>, scalar_prefetch = 0 : i64, scratch_operands = 0 : i64, tpu.core_type = #tpu.core_type<tc>, window_params = [{transform_indices = @transform_0, window_bounds = array<i64: 2, 1, 8>}, {transform_indices = @transform_1, window_bounds = array<i64: 2, 8, 1>}, {transform_indices = @transform_2, window_bounds = array<i64: 2, 1, 8>}, {transform_indices = @transform_3, window_bounds = array<i64: 2, 8, 1>}, {transform_indices = @transform_4, window_bounds = array<i64: 2, 8, 32>}, {transform_indices = @transform_5, window_bounds = array<i64: 2, 8, 8>}]} {
    %c0 = arith.constant 0 : index
    %c0_0 = arith.constant 0 : index
    %c0_1 = arith.constant 0 : index
    %0 = vector.load %arg5[%c0, %c0_0, %c0_1] : memref<2x8x32xf32, #tpu.memory_space<vmem>>, vector<2x8x32xf32>
    %c0_2 = arith.constant 0 : index
    %c0_3 = arith.constant 0 : index
    %c0_4 = arith.constant 0 : index
    %1 = vector.load %arg1[%c0_2, %c0_3, %c0_4] : memref<2x1x8xf32, #tpu.memory_space<vmem>>, vector<2x1x8xf32>
    %c0_5 = arith.constant 0 : index
    %c0_6 = arith.constant 0 : index
    %c0_7 = arith.constant 0 : index
    %2 = vector.load %arg2[%c0_5, %c0_6, %c0_7] : memref<2x8x1xf32, #tpu.memory_space<vmem>>, vector<2x8x1xf32>
    %c0_8 = arith.constant 0 : index
    %c0_9 = arith.constant 0 : index
    %c0_10 = arith.constant 0 : index
    %3 = vector.load %arg3[%c0_8, %c0_9, %c0_10] : memref<2x1x8xf32, #tpu.memory_space<vmem>>, vector<2x1x8xf32>
    %c0_11 = arith.constant 0 : index
    %c0_12 = arith.constant 0 : index
    %c0_13 = arith.constant 0 : index
    %4 = vector.load %arg4[%c0_11, %c0_12, %c0_13] : memref<2x8x1xf32, #tpu.memory_space<vmem>>, vector<2x8x1xf32>
    "tpu.trace_start"() <{level = 10 : i32, message = "bid,bjd->bij"}> : () -> ()
    %cst = arith.constant dense<0.000000e+00> : vector<2x8x8xf32>
    %5 = tpu.matmul %0, %0, %cst {dimension_numbers = #tpu.dot_dimension_numbers<[2], [2], [1], [1], [0, 0, 0, 1, 1, 1], [0], [0]>} : vector<2x8x32xf32>, vector<2x8x32xf32>, vector<2x8x8xf32> -> vector<2x8x8xf32>
    "tpu.trace_stop"() : () -> ()
    %6 = vector.broadcast %4 : vector<2x8x1xf32> to vector<2x8x8xf32>
    %7 = vector.broadcast %3 : vector<2x1x8xf32> to vector<2x8x8xf32>
    %8 = arith.mulf %6, %7 : vector<2x8x8xf32>
    %cst_14 = arith.constant 9.99999997E-7 : f32
    %9 = vector.broadcast %cst_14 : f32 to vector<2x8x8xf32>
    %10 = arith.addf %9, %8 : vector<2x8x8xf32>
    %11 = tpu.reciprocal %10 {approx = true} : vector<2x8x8xf32> -> vector<2x8x8xf32>
    %cst_15 = arith.constant 5.000000e-01 : f32
    %12 = vector.broadcast %cst_15 : f32 to vector<2x1x8xf32>
    %13 = arith.mulf %12, %1 : vector<2x1x8xf32>
    %cst_16 = arith.constant 1.000000e+00 : f32
    %14 = vector.broadcast %cst_16 : f32 to vector<2x1x8xf32>
    %15 = arith.addf %13, %14 : vector<2x1x8xf32>
    %16 = arith.mulf %5, %11 : vector<2x8x8xf32>
    %cst_17 = arith.constant 5.000000e-01 : f32
    %17 = vector.broadcast %cst_17 : f32 to vector<2x8x8xf32>
    %18 = arith.mulf %17, %16 : vector<2x8x8xf32>
    %19 = vector.broadcast %15 : vector<2x1x8xf32> to vector<2x8x8xf32>
    %20 = arith.subf %19, %18 : vector<2x8x8xf32>
    %cst_18 = arith.constant 0.000000e+00 : f32
    %21 = vector.broadcast %cst_18 : f32 to vector<2x8x1xf32>
    %22 = arith.cmpf oeq, %2, %21 : vector<2x8x1xf32>
    %cst_19 = arith.constant 0.000000e+00 : f32
    %cst_20 = arith.constant 1.000000e+00 : f32
    %23 = vector.broadcast %cst_19 : f32 to vector<2x8x1xf32>
    %24 = vector.broadcast %cst_20 : f32 to vector<2x8x1xf32>
    %25 = arith.select %22, %23, %24 : vector<2x8x1xi1>, vector<2x8x1xf32>
    %cst_21 = arith.constant 0.000000e+00 : f32
    %26 = vector.broadcast %cst_21 : f32 to vector<2x1x8xf32>
    %27 = arith.cmpf oeq, %1, %26 : vector<2x1x8xf32>
    %cst_22 = arith.constant 0.000000e+00 : f32
    %cst_23 = arith.constant 1.000000e+00 : f32
    %28 = vector.broadcast %cst_22 : f32 to vector<2x1x8xf32>
    %29 = vector.broadcast %cst_23 : f32 to vector<2x1x8xf32>
    %30 = arith.select %27, %28, %29 : vector<2x1x8xi1>, vector<2x1x8xf32>
    %31 = vector.broadcast %25 : vector<2x8x1xf32> to vector<2x8x8xf32>
    %32 = vector.broadcast %30 : vector<2x1x8xf32> to vector<2x8x8xf32>
    %33 = arith.mulf %31, %32 : vector<2x8x8xf32>
    %34 = arith.mulf %20, %33 : vector<2x8x8xf32>
    %cst_24 = arith.constant 0.899999976 : f32
    %35 = vector.broadcast %cst_24 : f32 to vector<2x8x8xf32>
    %36 = arith.cmpf ogt, %34, %35 : vector<2x8x8xf32>
    %37 = tpu.iota {dimensions = array<i32: 1>} : vector<2x8x8xi32>
    %38 = tpu.iota {dimensions = array<i32: 2>} : vector<2x8x8xi32>
    %39 = arith.cmpi ne, %37, %38 : vector<2x8x8xi32>
    %40 = arith.andi %36, %39 : vector<2x8x8xi1>
    %cst_25 = arith.constant 1.000000e+00 : f32
    %cst_26 = arith.constant 0.000000e+00 : f32
    %41 = vector.broadcast %cst_25 : f32 to vector<2x8x8xf32>
    %42 = vector.broadcast %cst_26 : f32 to vector<2x8x8xf32>
    %43 = arith.select %40, %41, %42 : vector<2x8x8xi1>, vector<2x8x8xf32>
    %c0_27 = arith.constant 0 : index
    %c0_28 = arith.constant 0 : index
    %c0_29 = arith.constant 0 : index
    %44 = vector.load %arg6[%c0_27, %c0_28, %c0_29] : memref<2x8x8xf32, #tpu.memory_space<vmem>>, vector<2x8x8xf32>
    tpu.vector_store %arg6[%c0_27, %c0_28, %c0_29], %43 {strides = array<i32>} : memref<2x8x8xf32, #tpu.memory_space<vmem>>, vector<2x8x8xf32>,
    return
  }
  func.func @transform_0(%arg0: i32) -> (i32, i32, i32) {
    %c0_i32 = arith.constant 0 : i32
    %c0_i32_0 = arith.constant 0 : i32
    %c0_i32_1 = arith.constant 0 : i32
    return %arg0, %c0_i32, %c0_i32_0 : i32, i32, i32
  }
  func.func @transform_1(%arg0: i32) -> (i32, i32, i32) {
    %c0_i32 = arith.constant 0 : i32
    %c0_i32_0 = arith.constant 0 : i32
    %c0_i32_1 = arith.constant 0 : i32
    return %arg0, %c0_i32, %c0_i32_0 : i32, i32, i32
  }
  func.func @transform_2(%arg0: i32) -> (i32, i32, i32) {
    %c0_i32 = arith.constant 0 : i32
    %c0_i32_0 = arith.constant 0 : i32
    %c0_i32_1 = arith.constant 0 : i32
    return %arg0, %c0_i32, %c0_i32_0 : i32, i32, i32
  }
  func.func @transform_3(%arg0: i32) -> (i32, i32, i32) {
    %c0_i32 = arith.constant 0 : i32
    %c0_i32_0 = arith.constant 0 : i32
    %c0_i32_1 = arith.constant 0 : i32
    return %arg0, %c0_i32, %c0_i32_0 : i32, i32, i32
  }
  func.func @transform_4(%arg0: i32) -> (i32, i32, i32) {
    %c0_i32 = arith.constant 0 : i32
    %c0_i32_0 = arith.constant 0 : i32
    %c0_i32_1 = arith.constant 0 : i32
    return %arg0, %c0_i32, %c0_i32_0 : i32, i32, i32
  }
  func.func @transform_5(%arg0: i32) -> (i32, i32, i32) {
    %c0_i32 = arith.constant 0 : i32
    %c0_i32_0 = arith.constant 0 : i32
    %c0_i32_1 = arith.constant 0 : i32
    return %arg0, %c0_i32, %c0_i32_0 : i32, i32, i32
  }
}

</mosaic_0001>

<bundles_post_ra>
// kernel: tpu_custom_call.1
= control target key start
LH: loop header
LB: loop body
LE: loop exit
PB: predicated region body
PF: predicated region fallthrough
CT: control target
= control target key end

     0   :  { %vm31_vm0 = vcmask 261120   ;;  %v354_v2 = vmov 0.0   ;;  %s443_s0 = inlined_call_operand.vmem [shape: f32[2,1,8], index: 0, kind: input, shape index: {}]   ;;  %s444_s1 = inlined_call_operand.vmem [shape: f32[2,8,1], index: 1, kind: input, shape index: {}]   ;;  %s445_s2 = inlined_call_operand.vmem [shape: f32[2,1,8], index: 2, kind: input, shape index: {}]   ;;  %s446_s3 = inlined_call_operand.vmem [shape: f32[2,8,1], index: 3, kind: input, shape index: {}]   ;;  %s447_s4 = inlined_call_operand.vmem [shape: f32[2,8,32], index: 4, kind: input, shape index: {}]   ;;  %s448_s5 = inlined_call_operand.hbm [shape: f32[2,8,8], index: 5, kind: output, shape index: {}]  }
   0x1   :  { %v21_v0 = vld [vmem:[%s447_s4] sm:$0xff]  ;;  %v22_v1 = vld [vmem:[%s447_s4 + $0x8] sm:$0xff]  ;;  %302 = vmatprep.subr.mxu0 %v354_v2  ;;  %307 = vmatprep.subr.mxu1 %v354_v2 }
   0x2   :  { %v25_v3 = vld [vmem:[%s444_s1] sm:$0xff]  ;;  %303 = vmatpush3.xpose.msk.msra.mxu0 %vm31_vm0, %v21_v0  ;;  %308 = vmatpush3.xpose.msk.msra.mxu1 %vm31_vm0, %v22_v1  ;;  %v26_v4 = vld [vmem:[%s444_s1 + $0x8] sm:$0xff] }
   0x3   :  { %vm228_vm1 = vcmp.eq.f32.partialorder %v25_v3, 0.0 }
   0x4   :  { %10 = vsyncpa [#allocation3], 0  ;;  %vm355_vm2 = vmmov 0   ;;  %v29_v5 = vld [vmem:[%s446_s3] sm:$0xff]  ;;  %vm229_vm3 = vcmp.eq.f32.partialorder %v26_v4, 0.0  ;;  %v356_v6 = vmov 1.0   ;;  %v216_v20 = vlaneseq }
   0x5   :  { %304 = vmatprep.mubr.msk.f32.mxu0 %vm355_vm2, %v354_v2  ;;  %309 = vmatprep.mubr.msk.f32.mxu1 %vm355_vm2, %v354_v2  ;;  %v230_v7 = vsel %vm228_vm1, 0.0, %v356_v6  ;;  %v357_v8 = vmov 0   ;;  %v231_v9 = vsel %vm229_vm3, 0.0, %v356_v6  ;;  %v30_v11 = vld [vmem:[%s446_s3 + $0x8] sm:$0xff]  ;;  %v296_v13 = vld [vmem:[%s445_s2] ss:$0 sm:$0xff] }
   0x6   :  { %319 = vset.pattern.permute.xlu0 %v357_v8  ;;  %320 = vset.pattern.permute.xlu1 %v357_v8  ;;  %v321_v10 = vpack.i.bf16 %v231_v9, %v230_v7  ;;  %v297_v15 = vld [vmem:[%s445_s2 + $0x1] ss:$0 sm:$0xff]  ;;  %v23_v21 = vld [vmem:[%s443_s0] sm:$0x1]  ;;  %v217_v23 = vshrl.u32 %v216_v20, 7  ;;  %v267_v46 = vand.u32 127, %v216_v20 }
   0x7   :  { %305 = vmatmul.mubr.msk.f32.vlgmr.msra.gmra.mrb[0].mxu0 %vm31_vm0, %v21_v0  ;;  %310 = vmatmul.mubr.msk.f32.vlgmr.msra.gmra.mrb[0].mxu1 %vm31_vm0, %v22_v1  ;;  %v24_v22 = vld [vmem:[%s443_s0 + $0x1] sm:$0x1]  ;;  %v206_v24 = vmul.f32 0.5, %v23_v21  ;;  %vm232_vm4 = vcmp.eq.f32.partialorder %v23_v21, 0.0  ;;  %s358_s0 = smov [#allocation2]   ;;  %vm273_vm7 = vcmask 64512  }
   0x8   :  { %180 = vperm.xlu0 %319, %v29_v5   ;;  %322 = vperm.xlu1 %320, %v321_v10   ;;  %v207_v25 = vmul.f32 0.5, %v24_v22  ;;  %vm233_vm5 = vcmp.eq.f32.partialorder %v24_v22, 0.0  ;;  %v218_v26 = vsub.s32 0, %v217_v23  ;;  %v234_v28 = vsel %vm232_vm4, 0.0, %v356_v6  ;;  %s281_s2 = sshll.u32 %s358_s0, 4  ;;  %s282_s2 = int_to_ptr.vmem [resolvable:$true] %s281_s2 }
   0x9   :  { %v235_v29 = vsel %vm233_vm5, 0.0, %v356_v6  ;;  %v208_v30 = vadd.f32 1.0, %v206_v24  ;;  %vm268_vm6 = vcmp.ne.s32.totalorder %v217_v23, %v267_v46  ;;  %s330_s10 = scalar_lea.vmem %s282_s2, 256  ;;  %p335_p1 = scmp.lt.s32.totalorder %s282_s2, %s282_s2 }
   0xa   :  { %v209_v31 = vadd.f32 1.0, %v207_v25  ;;  %v251_v35 = vrot.slane %v234_v28, %v218_v26  ;;  %v255_v36 = vrot.slane %v235_v29, %v218_v26  ;;  %p331_p0 = scmp.ne.s32.totalorder %s282_s2, %s330_s10  ;;  %p336_p2 = scmp.lt.s32.totalorder %s330_s10, %s330_s10 }
   0xb   :  { %v219_v41 = vrot.slane %v208_v30, %v218_v26 }
   0xc   :  { %185 = vperm.xlu0 %319, %v30_v11   ;;  %v223_v43 = vrot.slane %v209_v31, %v218_v26  ;;  %p337_p3 = por %p336_p2, %p335_p1 }
   0xe   :  { %p338_p4 = pnand %p337_p3, %p331_p0 }
  0x87   :  { %v181_v12 = vpop.permute.xlu0 %180  ;;  %v323_v27 = vpop.permute.xlu1 %322 }
  0x88   :  { %v200_v16 = vmul.f32 %v296_v13, %v181_v12  ;;  %v325_v33 = vunpack.i.h.bf16 %v323_v27  ;;  %v324_v34 = vunpack.i.l.bf16 %v323_v27 }
  0x8a   :  { %v202_v18 = vadd.f32 1e-06, %v200_v16  ;;  %v258_v49 = vmul.f32 %v324_v34, %v251_v35  ;;  %v259_v50 = vmul.f32 %v325_v33, %v255_v36 }
  0x8b   :  { %v186_v14 = vpop.permute.xlu0 %185 }
  0x8c   :  { %v201_v17 = vmul.f32 %v297_v15, %v186_v14  ;;  %326 = vrcp.f32 %v202_v18 }
  0x8e   :  { %v203_v19 = vadd.f32 1e-06, %v201_v17 }
  0x90   :  { %328 = vrcp.f32 %v203_v19 }
  0x96   :  { %v327_v32 = vpop.eup %326 }
  0x9a   :  { %v329_v37 = vpop.eup %328 }
  0xda   :  { %v101_v38 = vpop.f32.mrb[0].mxu0  ;;  %v174_v39 = vpop.f32.mrb[0].mxu1 }
  0xdb   :  { %v210_v40 = vmul.f32 %v327_v32, %v101_v38  ;;  %v211_v42 = vmul.f32 %v329_v37, %v174_v39  ;;  %v306_v44 = vpop.f32.mrb[1].mxu0  ;;  %v311_v45 = vpop.f32.mrb[1].mxu1 }
  0xdd   :  { %v212_v47 = vmul.f32 0.5, %v210_v40  ;;  %v213_v48 = vmul.f32 0.5, %v211_v42 }
  0xdf   :  { %v226_v51 = vsub.f32 %v219_v41, %v212_v47  ;;  %v227_v52 = vsub.f32 %v223_v43, %v213_v48 }
  0xe1   :  { %v260_v53 = vmul.f32 %v258_v49, %v226_v51  ;;  %v261_v54 = vmul.f32 %v259_v50, %v227_v52 }
  0xe3   :  { %vm262_vm8 = vcmp.gt.f32.partialorder %v260_v53, 0.9  ;;  %vm263_vm9 = vcmp.gt.f32.partialorder %v261_v54, 0.9 }
  0xe4   :  { %vm269_vm10 = vmand %vm262_vm8, %vm268_vm6 }
  0xe5   :  { %vm270_vm11 = vmand %vm263_vm9, %vm268_vm6  ;;  %v271_v55 = vsel %vm269_vm10, 1.0, %v354_v2 }
  0xe6   :  { %v272_v56 = vsel %vm270_vm11, 1.0, %v354_v2  ;;  %274 = vst.msk [vmem:[#allocation2] sm:$0xff] %vm273_vm7, %v271_v55 }
  0xe7   :  { %275 = vst.msk [vmem:[#allocation2 + $0x8] sm:$0xff] %vm273_vm7, %v272_v56 }
  0xe8   :  { %341 = shalt.err (!%p338_p4)
}
  0xe9   :  { %s342_s13 = scalar_lea.hbm %s448_s5, 256 }
  0xea   :  { %p343_p5 = scmp.ne.s32.totalorder %s448_s5, %s342_s13  ;;  %p346_p6 = scmp.lt.u32.totalorder %s342_s13, %s448_s5 }
  0xec   :  { %p348_p7 = pnand %p346_p6, %p343_p5 }
  0xee   :  { %351 = shalt.err (!%p348_p7)
}
  0xef   :  { %s359_s18 = smov 128   ;;  %s360_s19 = smov 8  }
  0xf0   :  { %287 = dma.vmem_to_hbm [thread:$0]  %s282_s2, 256, %s448_s5, [#allocation3], %s359_s18, %s359_s18, %s360_s19  }
  0xf1   :  { %352 = dma.done.wait [#allocation3], 256  }
  0xf2   :  { %353 = vsyncadd [#allocation3], 4294967040 }
  0xf3   :  { %291 = vsyncpa [#allocation3], 1 }

</bundles_post_ra>
